<compile_context>
chip_gen: v7x
topology: tpu7x:2x2x1
jax: 0.10.0
libtpu: 0.0.40
codegen_flags: <defaults>
</compile_context>

<pallas_src>
import math
import functools

import jax
import jax.numpy as jnp
import numpy as np
from jax import lax
from jax.experimental import pallas as pl
from jax.experimental.pallas import tpu as pltpu


def _qkv_single_kv_kernel(q_ref, k_ref, v_ref, o_ref, *, scale):
    """Fast path: the whole kv sequence fits in one tile -> one-shot softmax."""
    q = q_ref[0] * scale          # (ch, tq), native dtype
    k = k_ref[0] * scale          # (ch, L)
    v = v_ref[0]                  # (ch, L)

    # Scores in (kv, q) orientation (contraction over channel dim of both
    # operands -> Mosaic feeds the MXU directly, no XLU relayout).
    s = lax.dot_general(k, q, dimension_numbers=(((0,), (0,)), ((), ())),
                        preferred_element_type=jnp.float32)      # (L, tq) f32

    m = jnp.max(s, axis=0, keepdims=True)                        # (1, tq)
    p = jnp.exp(s - m)                                           # (L, tq) f32
    l = jnp.sum(p, axis=0, keepdims=True)                        # (1, tq)

    # a[c, t] = sum_s v[c, s] * p[s, t]  -- already the (ch, tq) output layout.
    out = jnp.dot(v, p.astype(v.dtype), preferred_element_type=jnp.float32)
    inv_l = pl.reciprocal(l, approx=False)
    o_ref[0] = (out * inv_l).astype(o_ref.dtype)


def _flash_qkv_kernel(q_ref, k_ref, v_ref, o_ref, m_ref, l_ref, acc_ref,
                      *, scale, length, kv_tile):
    """Flash path: online softmax over the kv grid axis (last, 'arbitrary')."""
    ki = pl.program_id(3)

    @pl.when(ki == 0)
    def _init():
        m_ref[...] = jnp.full(m_ref.shape, -jnp.inf, dtype=m_ref.dtype)
        l_ref[...] = jnp.zeros(l_ref.shape, dtype=l_ref.dtype)
        acc_ref[...] = jnp.zeros(acc_ref.shape, dtype=acc_ref.dtype)

    # Blocks are (1, ch, tile); drop the leading head axis.  Keep native dtype
    # into the MXU; scale applied to both q and k as in the PyTorch module.
    q = q_ref[0] * scale          # (ch, tq)
    k = k_ref[0] * scale          # (ch, tk)
    v = v_ref[0]                  # (ch, tk)

    s = lax.dot_general(k, q, dimension_numbers=(((0,), (0,)), ((), ())),
                        preferred_element_type=jnp.float32)      # (tk, tq) f32

    if length % kv_tile != 0:
        # Last kv tile is partial: mask padded key rows and padded v columns.
        kv_pos = ki * kv_tile + lax.broadcasted_iota(jnp.int32, s.shape, 0)
        s = jnp.where(kv_pos < length, s, -jnp.inf)
        v_pos = ki * kv_tile + lax.broadcasted_iota(jnp.int32, v.shape, 1)
        v = jnp.where(v_pos < length, v, jnp.zeros_like(v))

    m_prev = m_ref[...]                                          # (1, tq)
    m_new = jnp.maximum(m_prev, jnp.max(s, axis=0, keepdims=True))
    alpha = jnp.exp(m_prev - m_new)                              # (1, tq)
    p = jnp.exp(s - m_new)                                       # (tk, tq) f32

    l_ref[...] = alpha * l_ref[...] + jnp.sum(p, axis=0, keepdims=True)

    contrib = jnp.dot(v, p.astype(v.dtype), preferred_element_type=jnp.float32)
    acc_ref[...] = alpha * acc_ref[...] + contrib
    m_ref[...] = m_new

    @pl.when(ki == pl.num_programs(3) - 1)
    def _finalize():
        inv_l = pl.reciprocal(l_ref[...], approx=False)
        o_ref[0] = (acc_ref[...] * inv_l).astype(o_ref.dtype)


def qkv_attention(qkv, n_heads, *, q_tile=512, kv_tile=1024):
    """Pallas implementation of QKVAttention.forward (channel-first qkv)."""
    bs, width, length = qkv.shape
    assert width % (3 * n_heads) == 0
    ch = width // (3 * n_heads)
    assert ch % 8 == 0, "per-head channel count must be a multiple of 8"
    scale = 1.0 / math.sqrt(math.sqrt(ch))

    # Full length when it fits, otherwise a 128-multiple cap.
    def _tile(cap):
        if length <= cap:
            return length
        assert cap % 128 == 0
        return cap

    tq = _tile(q_tile)
    tk = _tile(kv_tile)
    nq = pl.cdiv(length, tq)
    nk = pl.cdiv(length, tk)

    out_shape = jax.ShapeDtypeStruct((bs, n_heads * ch, length), qkv.dtype)
    compiler_params = dict(vmem_limit_bytes=32 * 1024 * 1024)

    # Index directly into the original (bs, 3*H*ch, length) tensor: the channel
    # block index is in units of `ch`, so head h of q/k/v lives at block index
    # h / (n_heads + h) / (2*n_heads + h).  No split/reshape before the kernel.
    if nk == 1:
        # ---- single-kv-tile fast path: no scratch, one-shot softmax ----
        q_spec = pl.BlockSpec((1, ch, tq), lambda b, h, qi: (b, h, qi))
        k_spec = pl.BlockSpec((1, ch, tk), lambda b, h, qi: (b, n_heads + h, 0))
        v_spec = pl.BlockSpec((1, ch, tk), lambda b, h, qi: (b, 2 * n_heads + h, 0))
        o_spec = pl.BlockSpec((1, ch, tq), lambda b, h, qi: (b, h, qi))

        return pl.pallas_call(
            functools.partial(_qkv_single_kv_kernel, scale=scale),
            out_shape=out_shape,
            grid_spec=pltpu.PrefetchScalarGridSpec(
                num_scalar_prefetch=0,
                grid=(bs, n_heads, nq),
                in_specs=[q_spec, k_spec, v_spec],
                out_specs=o_spec,
            ),
            compiler_params=pltpu.CompilerParams(
                dimension_semantics=("parallel", "parallel", "parallel"),
                **compiler_params,
            ),
        )(qkv, qkv, qkv)

    # ---- flash / online-softmax path for long sequences ----
    q_spec = pl.BlockSpec((1, ch, tq), lambda b, h, qi, ki: (b, h, qi))
    k_spec = pl.BlockSpec((1, ch, tk), lambda b, h, qi, ki: (b, n_heads + h, ki))
    v_spec = pl.BlockSpec((1, ch, tk), lambda b, h, qi, ki: (b, 2 * n_heads + h, ki))
    o_spec = pl.BlockSpec((1, ch, tq), lambda b, h, qi, ki: (b, h, qi))

    return pl.pallas_call(
        functools.partial(_flash_qkv_kernel, scale=scale, length=length,
                          kv_tile=tk),
        out_shape=out_shape,
        grid_spec=pltpu.PrefetchScalarGridSpec(
            num_scalar_prefetch=0,
            grid=(bs, n_heads, nq, nk),
            in_specs=[q_spec, k_spec, v_spec],
            out_specs=o_spec,
            scratch_shapes=[
                pltpu.VMEM((1, tq), jnp.float32),    # running max
                pltpu.VMEM((1, tq), jnp.float32),    # running denominator
                pltpu.VMEM((ch, tq), jnp.float32),   # output accumulator
            ],
        ),
        compiler_params=pltpu.CompilerParams(
            dimension_semantics=("parallel", "parallel", "parallel", "arbitrary"),
            **compiler_params,
        ),
    )(qkv, qkv, qkv)


def qkv_attention_reference(qkv, n_heads):
    """Plain-JAX reference mirroring the PyTorch forward exactly."""
    bs, width, length = qkv.shape
    ch = width // (3 * n_heads)
    q, k, v = jnp.split(qkv, 3, axis=1)
    q = q.reshape(bs * n_heads, ch, length)
    k = k.reshape(bs * n_heads, ch, length)
    v = v.reshape(bs * n_heads, ch, length)
    scale = 1.0 / math.sqrt(math.sqrt(ch))
    weight = jnp.einsum('bct,bcs->bts', q * scale, k * scale)
    weight = jax.nn.softmax(weight.astype(jnp.float32), axis=-1).astype(weight.dtype)
    a = jnp.einsum('bts,bcs->bct', weight, v)
    return a.reshape(bs, -1, length)


if __name__ == "__main__":
    # QKVAttention has no learnable parameters (only n_heads).
    key = jax.random.PRNGKey(0)

    # Small shape (single-kv fast path): bs=2, n_heads=2, ch=8, length=16
    # -> qkv (2, 48, 16).
    n_heads = 2
    bs, ch, length = 2, 8, 16
    qkv = jax.random.normal(key, (bs, 3 * n_heads * ch, length), dtype=jnp.float32)
    out = jax.block_until_ready(qkv_attention(qkv, n_heads))
    ref = jax.block_until_ready(qkv_attention_reference(qkv, n_heads))
    assert out.shape == (bs, n_heads * ch, length)
    np.testing.assert_allclose(np.asarray(out), np.asarray(ref),
                               rtol=1e-4, atol=1e-5)

    # Second config exercising the multi-tile flash path (nq=2, nk=2).
    n_heads2, bs2, ch2, length2 = 2, 1, 16, 256
    qkv2 = jax.random.normal(jax.random.PRNGKey(0),
                             (bs2, 3 * n_heads2 * ch2, length2),
                             dtype=jnp.float32)
    out2 = jax.block_until_ready(
        qkv_attention(qkv2, n_heads2, q_tile=128, kv_tile=128))
    ref2 = jax.block_until_ready(qkv_attention_reference(qkv2, n_heads2))
    np.testing.assert_allclose(np.asarray(out2), np.asarray(ref2),
                               rtol=1e-4, atol=1e-5)

    print("KERNEL_OK")
</pallas_src>

<mosaic_0001>
module attributes {stable_mosaic.version = 11 : i64} {
  func.func @_qkv_single_kv_kernel(%arg0: i32, %arg1: i32, %arg2: i32, %arg3: memref<1x8x16xf32, #tpu.memory_space<vmem>>, %arg4: memref<1x8x16xf32, #tpu.memory_space<vmem>>, %arg5: memref<1x8x16xf32, #tpu.memory_space<vmem>>, %arg6: memref<1x8x16xf32, #tpu.memory_space<vmem>>) attributes {dimension_semantics = [#tpu.dimension_semantics<parallel>, #tpu.dimension_semantics<parallel>, #tpu.dimension_semantics<parallel>], iteration_bounds = array<i64: 2, 2, 1>, scalar_prefetch = 0 : i64, scratch_operands = 0 : i64, tpu.core_type = #tpu.core_type<tc>, window_params = [{transform_indices = @transform_0, window_bounds = array<i64: 1, 8, 16>}, {transform_indices = @transform_1, window_bounds = array<i64: 1, 8, 16>}, {transform_indices = @transform_2, window_bounds = array<i64: 1, 8, 16>}, {transform_indices = @transform_3, window_bounds = array<i64: 1, 8, 16>}]} {
    %c0 = arith.constant 0 : index
    %c0_0 = arith.constant 0 : index
    %c0_1 = arith.constant 0 : index
    %0 = vector.load %arg3[%c0, %c0_0, %c0_1] : memref<1x8x16xf32, #tpu.memory_space<vmem>>, vector<1x8x16xf32>
    %1 = vector.shape_cast %0 : vector<1x8x16xf32> to vector<8x16xf32>
    %cst = arith.constant 0.594603539 : f32
    %2 = vector.broadcast %cst : f32 to vector<8x16xf32>
    %3 = arith.mulf %1, %2 : vector<8x16xf32>
    %c0_2 = arith.constant 0 : index
    %c0_3 = arith.constant 0 : index
    %c0_4 = arith.constant 0 : index
    %4 = vector.load %arg4[%c0_2, %c0_3, %c0_4] : memref<1x8x16xf32, #tpu.memory_space<vmem>>, vector<1x8x16xf32>
    %5 = vector.shape_cast %4 : vector<1x8x16xf32> to vector<8x16xf32>
    %cst_5 = arith.constant 0.594603539 : f32
    %6 = vector.broadcast %cst_5 : f32 to vector<8x16xf32>
    %7 = arith.mulf %5, %6 : vector<8x16xf32>
    %c0_6 = arith.constant 0 : index
    %c0_7 = arith.constant 0 : index
    %c0_8 = arith.constant 0 : index
    %8 = vector.load %arg5[%c0_6, %c0_7, %c0_8] : memref<1x8x16xf32, #tpu.memory_space<vmem>>, vector<1x8x16xf32>
    %9 = vector.shape_cast %8 : vector<1x8x16xf32> to vector<8x16xf32>
    %cst_9 = arith.constant dense<0.000000e+00> : vector<16x16xf32>
    %10 = tpu.matmul %7, %3, %cst_9 {dimension_numbers = #tpu.dot_dimension_numbers<[0], [0], [1], [1], [0, 1, 1, 1], [], []>} : vector<8x16xf32>, vector<8x16xf32>, vector<16x16xf32> -> vector<16x16xf32>
    %cst_10 = arith.constant dense<0xFF800000> : vector<16xf32>
    %11 = vector.multi_reduction <maximumf>, %10, %cst_10 [0] : vector<16x16xf32> to vector<16xf32>
    %12 = vector.shape_cast %11 : vector<16xf32> to vector<1x16xf32>
    %13 = vector.broadcast %12 : vector<1x16xf32> to vector<16x16xf32>
    %14 = arith.subf %10, %13 : vector<16x16xf32>
    %15 = math.exp %14 : vector<16x16xf32>
    %cst_11 = arith.constant dense<0.000000e+00> : vector<16xf32>
    %16 = vector.multi_reduction <add>, %15, %cst_11 [0] : vector<16x16xf32> to vector<16xf32>
    %17 = vector.shape_cast %16 : vector<16xf32> to vector<1x16xf32>
    %cst_12 = arith.constant dense<0.000000e+00> : vector<8x16xf32>
    %18 = tpu.matmul %9, %15, %cst_12 {dimension_numbers = #tpu.dot_dimension_numbers<[1], [0], [0], [1], [0, 0, 1, 1], [], []>} : vector<8x16xf32>, vector<16x16xf32>, vector<8x16xf32> -> vector<8x16xf32>
    %19 = tpu.reciprocal %17 : vector<1x16xf32> -> vector<1x16xf32>
    %20 = vector.broadcast %19 : vector<1x16xf32> to vector<8x16xf32>
    %21 = arith.mulf %18, %20 : vector<8x16xf32>
    %c0_13 = arith.constant 0 : index
    %c0_14 = arith.constant 0 : index
    %c0_15 = arith.constant 0 : index
    %22 = vector.load %arg6[%c0_13, %c0_14, %c0_15] : memref<1x8x16xf32, #tpu.memory_space<vmem>>, vector<1x8x16xf32>
    %23 = vector.shape_cast %22 : vector<1x8x16xf32> to vector<8x16xf32>
    %24 = vector.shape_cast %21 : vector<8x16xf32> to vector<1x8x16xf32>
    tpu.vector_store %arg6[%c0_13, %c0_14, %c0_15], %24 {strides = array<i32>} : memref<1x8x16xf32, #tpu.memory_space<vmem>>, vector<1x8x16xf32>,
    return
  }
  func.func @transform_0(%arg0: i32, %arg1: i32, %arg2: i32) -> (i32, i32, i32) {
    %c0_i32 = arith.constant 0 : i32
    return %arg0, %arg1, %arg2 : i32, i32, i32
  }
  func.func @transform_1(%arg0: i32, %arg1: i32, %arg2: i32) -> (i32, i32, i32) {
    %c2_i32 = arith.constant 2 : i32
    %0 = arith.addi %c2_i32, %arg1 : i32
    %c0_i32 = arith.constant 0 : i32
    %c0_i32_0 = arith.constant 0 : i32
    return %arg0, %0, %c0_i32 : i32, i32, i32
  }
  func.func @transform_2(%arg0: i32, %arg1: i32, %arg2: i32) -> (i32, i32, i32) {
    %c4_i32 = arith.constant 4 : i32
    %0 = arith.addi %c4_i32, %arg1 : i32
    %c0_i32 = arith.constant 0 : i32
    %c0_i32_0 = arith.constant 0 : i32
    return %arg0, %0, %c0_i32 : i32, i32, i32
  }
  func.func @transform_3(%arg0: i32, %arg1: i32, %arg2: i32) -> (i32, i32, i32) {
    %c0_i32 = arith.constant 0 : i32
    return %arg0, %arg1, %arg2 : i32, i32, i32
  }
}

</mosaic_0001>

<bundles_post_ra>
// kernel: tpu_custom_call.1
= control target key start
LH: loop header
LB: loop body
LE: loop exit
PB: predicated region body
PF: predicated region fallthrough
CT: control target
= control target key end

     0   :  { %8 = vsyncpa [#allocation3], 0  ;;  %s1043_s0 = inlined_call_operand.vmem [shape: f32[2,48,16], index: 0, kind: input, shape index: {}]   ;;  %s1044_s1 = inlined_call_operand.vmem [shape: f32[2,48,16], index: 1, kind: input, shape index: {}]   ;;  %s1045_s2 = inlined_call_operand.vmem [shape: f32[2,48,16], index: 2, kind: input, shape index: {}]   ;;  %s1046_s3 = inlined_call_operand.hbm [shape: f32[2,16,16], index: 3, kind: output, shape index: {}]  }
   0x1   :  { %10 = vsyncpa [#allocation3 + $0x1], 0  ;;  %s887_s12 = smov 0   ;;  %s889_s13 = smov 0  }
   0x2   :  { %s891_s14 = smov 0   ;;  %s893_s15 = smov 0  }
   0x3   :  { %s895_s16 = smov 0   ;;  %s897_s17 = smov 0  }
   0x4   :  { %s899_s18 = smov 0   ;;  %s901_s19 = smov 0  }
   0x5 LB: > { %s648_s20 = sadd.s32 4294967295, %s861_s19   ;;  %s649_s21 = sadd.s32 4294967294, %s861_s19   ;;  %s861_s19 = sphi %s901_s19, %s16_s19   ;;  %s857_s18 = sphi %s899_s18, %s1055_s18   ;;  %s853_s17 = sphi %s897_s17, %s1054_s17   ;;  %s849_s16 = sphi %s895_s16, %s1053_s16   ;;  %s845_s15 = sphi %s893_s15, %s1052_s15   ;;  %s841_s14 = sphi %s891_s14, %s1051_s14   ;;  %s837_s13 = sphi %s889_s13, %s1050_s13   ;;  %s833_s12 = sphi %s887_s12, %s1049_s12  }
   0x6   : > { %s31_s22 = sadd.s32 1, %s853_s17  ;;  %s35_s23 = sadd.s32 1, %s857_s18 }
   0x7   : > { %p33_p0 = scmp.ge.s32.totalorder %s31_s22, 2  ;;  %p146_p1 = scmp.ne.s32.totalorder %s841_s14, %s837_s13 }
   0x8   : > { %p147_p2 = scmp.eq.s32.totalorder %s648_s20, 3  ;;  %p152_p5 = scmp.ne.s32.totalorder %s837_s13, %s833_s12 }
   0x9   : > { %s1057_s22 = smov (%p33_p0, %s31_s22), 0  ;;  %s1059_s23 = smov (!%p33_p0, %s35_s23), %s857_s18 }
   0xa   : > { %s130_s24 = ssub.s32 %s853_s17, %s1057_s22  ;;  %p938_p3 = por %p147_p2, %p146_p1 }
   0xb   : > { %p37_p4 = scmp.ge.s32.totalorder %s1059_s23, 2  ;;  %p153_p6 = scmp.eq.s32.totalorder %s649_s21, 3 }
   0xc   : > { %p652_p7 = scmp.ge.s32.totalorder %s861_s19, 1  ;;  %p211_p9 = scmp.lt.s32.totalorder %s861_s19, 5 }
   0xd   : > { %s1061_s23 = smov (%p37_p4, %s1059_s23), 0  ;;  %p947_p8 = por %p153_p6, %p152_p5 }
   0xe   : > { %s129_s27 = ssub.s32 %s857_s18, %s1061_s23  ;;  %s136_s28 = sadd.s32 1, %s841_s14 }
   0xf   : > { %s131_s29 = sor.u32 %s130_s24, %s129_s27  ;;  %p212_p10 = pnand %p652_p7, %p211_p9 }
  0x10   : > { %p134_p11 = scmp.eq.s32.totalorder %s131_s29, 0  ;;  %p259_p12 = scmp.lt.s32.totalorder (!%p212_p10), %s849_s16, 1  ;;  %vm327_vm0 = vcmask (!%p212_p10), 64512   ;;  %v863_v6 = vmov (!%p212_p10), 0.0|0.0   ;;  %vm864_vm1 = vmmov (!%p212_p10), 0   ;;  %v865_v7 = vmov (!%p212_p10), 0.0  }
  0x11   : > { %215 = sbr.rel (%p212_p10) target bundleno = 644 (0x284), region = 32  ;;  %s270_s4 = sadd.s32 (!%p212_p10), 2, %s845_s15  ;;  %683 = vmatprep.subr.bf16.mxu1 (!%p212_p10), %v863_v6  ;;  %680 = vmatprep.mubr.msk.f32.mxu1 (!%p212_p10), %vm864_vm1, %v865_v7  ;;  %vm409_vm2 = vcmask (!%p212_p10), 130048  }
  0x12   : > { %s956_s30 = scalar_select %p134_p11, %s841_s14, %s136_s28  }
  0x13   : > { %p273_p13 = scmp.lt.s32.totalorder (!%p212_p10), %s270_s4, 5  ;;  %p261_p0 = scmp.lt.s32.totalorder (!%p212_p10), %s845_s15, 5 }
  0x18   : > { %s260_s5 = scalar_select %p259_p12, %s849_s16, 1 }
  0x19   : > { %s1063_s4 = smov (!%p273_p13, %s270_s4), 5 }
  0x1a   : > { %s961_s6 = smul.u32 6, %s260_s5 }
  0x1b   : > { %s262_s20 = scalar_select %p261_p0, %s845_s15, 5 }
  0x1c   : > { %s276_s7 = sadd.s32 %s961_s6, %s1063_s4  ;;  %s280_s4 = sadd.s32 4, %s845_s15 }
  0x1d   : > { %s655_s8 = sshll.u32 %s276_s7, 3  ;;  %s267_s21 = sadd.s32 %s961_s6, %s262_s20 }
  0x1e   : > { %s278_s11 = scalar_lea.vmem %s1044_s1, %s655_s8  ;;  %s654_s24 = sshll.u32 %s267_s21, 3 }
  0x1f   : > { %v292_v0 = vld [vmem:[%s278_s11] sm:$0xff]  ;;  %s269_s29 = scalar_lea.vmem %s1043_s0, %s654_s24  ;;  %p283_p1 = scmp.lt.s32.totalorder %s280_s4, 5 }
  0x20   : > { %v293_v1 = vmul.f32 0.59460354, %v292_v0  ;;  %v290_v2 = vld [vmem:[%s269_s29] sm:$0xff]  ;;  %s661_s20 = sshll.u32 %s849_s16, 1 }
  0x21   : > { %v291_v3 = vmul.f32 0.59460354, %v290_v2  ;;  %s1065_s4 = smov (!%p283_p1, %s280_s4), 5  ;;  %s523_s21 = sadd.s32 %s845_s15, %s661_s20 }
  0x22   : > { %295 = vxpose.xlu0.b32.start.end [1/1] (short) (narrow) %v293_v1, 16  ;;  %s286_s5 = sadd.s32 %s961_s6, %s1065_s4  ;;  %s256_s6 = sand.u32 1, %s837_s13  }
  0x23   : > { %671 = vmatprep.subr.mxu0 %v291_v3  ;;  %s656_s7 = sshll.u32 %s286_s5, 3  ;;  %s653_s11 = sshll.u32 %s256_s6, 3 }
  0x24   : > { %672 = vmatpush3.msra.mxu0 %v291_v3  ;;  %s288_s10 = scalar_lea.vmem %s1045_s2, %s656_s7  ;;  %s662_s24 = sshll.u32 %s523_s21, 7 }
  0x25   : > { %v294_v29 = vld [vmem:[%s288_s10] sm:$0xff]  ;;  %s258_s27 = scalar_lea.vmem [#allocation2], %s653_s11  ;;  %s989_s5 = scalar_lea.hbm %s1046_s3, %s662_s24 }
  0x26   : > { %s527_s28 = sshll.u32 %s258_s27, 4  ;;  %s511_s15 = scalar_lea.sflag [#allocation3], %s256_s6  ;;  %s991_s28 = int_to_ptr.vmem [resolvable:$true] %s527_s28 }
  0x27   : > { %s767_s16 = scalar_lea.vmem %s991_s28, 128  ;;  %s866_s7 = smov [#allocation2]  }
  0x28   : > { %p768_p2 = scmp.ne.s32.totalorder %s991_s28, %s767_s16  ;;  %s771_s8 = sshll.u32 %s866_s7, 4  ;;  %s772_s8 = int_to_ptr.vmem [resolvable:$false] %s771_s8 }
  0x29   : > { %s773_s9 = scalar_lea.vmem %s772_s8, 256  ;;  %p774_p6 = scmp.lt.s32.totalorder %s991_s28, %s772_s8 }
  0x2a   : > { %p769_p4 = pnand %p768_p2, %p938_p3  ;;  %p775_p7 = scmp.lt.s32.totalorder %s773_s9, %s767_s16 }
  0x2c   : > { %p770_p5 = pneg %p769_p4  ;;  %p776_p9 = por %p775_p7, %p774_p6 }
  0x2e   : > { %p777_p10 = pnand %p776_p9, %p770_p5 }
  0xa2   : > { %v311_v4 = vpop.trf.xlu0 }
  0xa3   : > { %673 = vmatprep.mubr.msk.f32.mxu0 %vm327_vm0, %v311_v4 }
  0xa6   : > { %v312_v5 = vpop.trf.xlu0 }
  0xa7   : > { %674 = vmatmul.mubr.msk.f32.vlgmr.msra.gmra.mrb[0].mxu0 %vm327_vm0, %v312_v5 }
 0x17a   : > { %v675_v8 = vpop.f32.mrb[0].mxu0 }
 0x17b   : > { %v411_v9 = vsel %vm409_vm2, %v675_v8, -inf  ;;  %v400_v10 = vpop.f32.mrb[1].mxu0 }
 0x17c   : > { %v410_v11 = vsel %vm409_vm2, %v400_v10, -inf }
 0x17d   : > { %v412_v12 = vmax.f32 %v410_v11, %v411_v9 }
 0x17f   : > { %v413_v13 = vrot.slane %v412_v12, 4 }
 0x181   : > { %v414_v14 = vmax.f32 %v412_v12, %v413_v13 }
 0x183   : > { %v415_v15 = vrot.slane %v414_v14, 2 }
 0x185   : > { %v416_v16 = vmax.f32 %v414_v14, %v415_v15 }
 0x187   : > { %v417_v17 = vrot.slane %v416_v16, 1 }
 0x189   : > { %v418_v18 = vmax.f32 %v416_v16, %v417_v17 }
 0x18b   : > { %v419_v19 = vsub.f32 %v400_v10, %v418_v18  ;;  %v420_v20 = vsub.f32 %v675_v8, %v418_v18 }
 0x18d   : > { %v421_v21 = vmul.f32 1.442695, %v419_v19  ;;  %v423_v22 = vmul.f32 1.442695, %v420_v20 }
 0x18f   : > { %761 = vpow2.f32 %v421_v21 }
 0x190   : > { %763 = vpow2.f32 %v423_v22 }
 0x199   : > { %v762_v23 = vpop.eup %761 }
 0x19a   : > { %v764_v24 = vpop.eup %763  ;;  %v425_v25 = vsel %vm409_vm2, %v762_v23, 0.0 }
 0x19b   : > { %v426_v26 = vsel %vm409_vm2, %v764_v24, 0.0  ;;  %v684_v27 = vpack.c.bf16 %v764_v24, %v762_v23 }
 0x19c   : > { %v427_v28 = vadd.f32 %v426_v26, %v425_v25 }
 0x19d   : > { %685 = vmatpush3.bf16.msra.mxu1 %v684_v27 }
 0x19e   : > { %v428_v30 = vrot.slane %v427_v28, 4 }
 0x1a0   : > { %681 = vmatmul.mubr.msk.f32.vlgmr.msra.gmra.mrb[0].mxu1 %vm409_vm2, %v294_v29  ;;  %v429_v31 = vadd.f32 %v428_v30, %v427_v28 }
 0x1a2   : > { %v430_v32 = vrot.slane %v429_v31, 2 }
 0x1a4   : > { %v431_v33 = vadd.f32 %v430_v32, %v429_v31 }
 0x1a6   : > { %v432_v34 = vrot.slane %v431_v33, 1 }
 0x1a8   : > { %v433_v35 = vadd.f32 %v432_v34, %v431_v33 }
 0x1aa   : > { %765 = vrcp.f32 %v433_v35 }
 0x1b4   : > { %v766_v36 = vpop.eup %765 }
 0x273   : > { %v503_v37 = vpop.f32.mrb[0].mxu1 }
 0x274   : > { %v508_v38 = vmul.f32 %v766_v36, %v503_v37  ;;  %v682_v39 = vpop.f32.mrb[1].mxu1 }
 0x276   : > { %509 = vst.msk [vmem:[%s258_s27] sm:$0xff] %vm409_vm2, %v508_v38 }
 0x277   : > { %780 = shalt.err (!%p777_p10)
}
 0x278   : > { %s781_s10 = scalar_lea.hbm %s989_s5, 128  ;;  %s785_s20 = scalar_lea.hbm %s1046_s3, 512 }
 0x279   : > { %p782_p11 = scmp.ne.s32.totalorder %s989_s5, %s781_s10  ;;  %p786_p0 = scmp.lt.u32.totalorder %s989_s5, %s1046_s3 }
 0x27a   : > { %p787_p1 = scmp.lt.u32.totalorder %s785_s20, %s781_s10  ;;  %p789_p4 = scmp.lt.u32.totalorder %s781_s10, %s989_s5 }
 0x27b   : > { %p783_p12 = pnand %p782_p11, %p938_p3 }
 0x27c   : > { %p788_p2 = por %p787_p1, %p786_p0 }
 0x27d   : > { %p784_p13 = pneg %p783_p12 }
 0x27e   : > { %p790_p5 = por %p789_p4, %p788_p2 }
 0x280   : > { %p791_p6 = pnand %p790_p5, %p784_p13 }
 0x282   : > { %794 = shalt.err (!%p791_p6)
}
 0x283   : > { %687 = dma.vmem_to_hbm [thread:$0]  (%p938_p3), %s991_s28, 128, %s989_s5, %s511_s15  }
 0x284 PF: > { %p693_p7 = scmp.ge.s32.totalorder %s861_s19, 2  ;;  %s539_s27 = sand.u32 1, %s833_s12  }
 0x285   : > { %s540_s29 = scalar_lea.sflag [#allocation3], %s539_s27 }
 0x286   : > { %p690_p9 = pnand %p693_p7, %p947_p8 }
 0x288   : > { %828 = dma.done.wait (!%p690_p9), %s540_s29, 128  }
 0x289   : > { %830 = vsyncadd (!%p690_p9), %s540_s29, 4294967168  ;;  %s16_s19 = sadd.s32 1, %s861_s19   ;;  %s1049_s12 = smov %s837_s13 }
 0x28a   : > { %p13_p10 = scmp.ge.s32.totalorder %s16_s19, 6   ;;  %s1050_s13 = smov %s841_s14 }
 0x28b   : > { %s1051_s14 = smov %s956_s30  ;;  %s1052_s15 = smov %s853_s17 }
 0x28c   : > { %s1053_s16 = smov %s857_s18  ;;  %s1054_s17 = smov %s1057_s22 }
 0x28d   : > { %s1055_s18 = smov %s1061_s23  ;;  %15 = sbr.rel (!%p13_p10) target bundleno = 5 (0x5), region = 73 }
 0x294   :  { %545 = vsyncpa [#allocation3], 1 }
 0x295   :  { %547 = vsyncpa [#allocation3 + $0x1], 1 }

</bundles_post_ra>
